<compile_context>
chip_gen: v5e
topology: v5e:2x2
jax: 0.10.0
libtpu: 0.0.40
codegen_flags: <defaults>
</compile_context>

<pallas_src>
import jax
import jax.numpy as jnp
from jax import lax
from jax.experimental import pallas as pl
from jax.experimental.pallas import tpu as pltpu


def linear_kernel(x_ref, w_ref, b_ref, o_ref, acc_ref):
    # x_ref: (tm, tk)   activation tile
    # w_ref: (tn, tk)   PyTorch-layout weight tile (H, N) -> no host transpose
    # b_ref: (1, tn)    bias tile (broadcast over rows)
    # o_ref: (tm, tn)   output tile
    # acc_ref: (tm, tn) f32 accumulator scratch, resident across the K axis
    k = pl.program_id(2)

    @pl.when(k == 0)
    def _():
        acc_ref[...] = jnp.zeros_like(acc_ref)

    # Contract x's dim 1 (N) against w's dim 1 (N): y = x @ W^T on the MXU,
    # f32 accumulation.
    acc_ref[...] += lax.dot_general(
        x_ref[...], w_ref[...],
        dimension_numbers=(((1,), (1,)), ((), ())),
        preferred_element_type=jnp.float32,
    )

    @pl.when(k == pl.num_programs(2) - 1)
    def _():
        # Bias add in f32 epilogue (off the MXU critical path), then cast.
        o_ref[...] = (acc_ref[...] + b_ref[...]).astype(o_ref.dtype)


def _pick_tile(dim, preferred):
    """Use the preferred MXU/lane-aligned tile when it divides dim, else the full dim."""
    return preferred if (dim % preferred == 0 and dim >= preferred) else dim


def wf_assignment_forward(x, weight, bias, *, tm=256, tn=256, tk=512):
    """x: (B, N) f32; weight: (H, N) f32 (PyTorch layout, NOT transposed); bias: (H,) f32."""
    B, N = x.shape
    H, N2 = weight.shape
    assert N == N2, "weight inner dim must match x"

    tm = _pick_tile(B, tm)
    tn = _pick_tile(H, tn)
    tk = _pick_tile(N, tk)
    grid = (B // tm, H // tn, N // tk)

    b2d = bias.reshape(1, H)  # trivial 2-D view for TPU-friendly broadcast

    return pl.pallas_call(
        linear_kernel,
        out_shape=jax.ShapeDtypeStruct((B, H), jnp.float32),
        grid=grid,
        in_specs=[
            pl.BlockSpec((tm, tk), lambda i, j, k: (i, k)),   # x
            pl.BlockSpec((tn, tk), lambda i, j, k: (j, k)),   # weight (H, N)
            pl.BlockSpec((1, tn), lambda i, j, k: (0, j)),    # bias
        ],
        out_specs=pl.BlockSpec((tm, tn), lambda i, j, k: (i, j)),
        scratch_shapes=[pltpu.VMEM((tm, tn), jnp.float32)],
        compiler_params=pltpu.CompilerParams(
            dimension_semantics=("parallel", "parallel", "arbitrary"),
        ),
    )(x, weight, b2d)


def _reference(x, weight, bias):
    return x @ weight.T + bias


if __name__ == "__main__":
    key = jax.random.PRNGKey(0)

    # --- Small shapes consistent with the module: batch=8, N=32, HIDDEN=32 ---
    B, N, HIDDEN = 8, 32, 32
    kx, kw, kb, key = jax.random.split(key, 4)
    bound = 1.0 / (N ** 0.5)
    x = jax.random.normal(kx, (B, N), dtype=jnp.float32)
    weight = jax.random.uniform(kw, (HIDDEN, N), dtype=jnp.float32,
                                minval=-bound, maxval=bound)
    bias = jax.random.uniform(kb, (HIDDEN,), dtype=jnp.float32,
                              minval=-bound, maxval=bound)

    out = jax.block_until_ready(wf_assignment_forward(x, weight, bias))
    ref = _reference(x, weight, bias)
    assert out.shape == (B, HIDDEN)
    assert jnp.allclose(out, ref, atol=1e-5, rtol=1e-5), "small-shape mismatch"

    # --- Secondary check exercising the tiled, multi-step grid path ---
    B2, N2, H2 = 512, 1024, 512
    kx2, kw2, kb2, key = jax.random.split(key, 4)
    bound2 = 1.0 / (N2 ** 0.5)
    x2 = jax.random.normal(kx2, (B2, N2), dtype=jnp.float32)
    w2 = jax.random.uniform(kw2, (H2, N2), dtype=jnp.float32,
                            minval=-bound2, maxval=bound2)
    b2 = jax.random.uniform(kb2, (H2,), dtype=jnp.float32,
                            minval=-bound2, maxval=bound2)

    out2 = jax.block_until_ready(wf_assignment_forward(x2, w2, b2))
    ref2 = _reference(x2, w2, b2)
    assert out2.shape == (B2, H2)
    assert jnp.allclose(out2, ref2, atol=1e-3, rtol=1e-3), "tiled-shape mismatch"

    print("KERNEL_OK")
</pallas_src>

<mosaic_0001>
module attributes {stable_mosaic.version = 11 : i64} {
  func.func @linear_kernel(%arg0: i32, %arg1: i32, %arg2: i32, %arg3: memref<8x32xf32, #tpu.memory_space<vmem>>, %arg4: memref<32x32xf32, #tpu.memory_space<vmem>>, %arg5: memref<1x32xf32, #tpu.memory_space<vmem>>, %arg6: memref<8x32xf32, #tpu.memory_space<vmem>>, %arg7: memref<8x32xf32, #tpu.memory_space<vmem>>) attributes {dimension_semantics = [#tpu.dimension_semantics<parallel>, #tpu.dimension_semantics<parallel>, #tpu.dimension_semantics<arbitrary>], iteration_bounds = array<i64: 1, 1, 1>, scalar_prefetch = 0 : i64, scratch_operands = 1 : i64, tpu.core_type = #tpu.core_type<tc>, window_params = [{transform_indices = @transform_0, window_bounds = array<i64: 8, 32>}, {transform_indices = @transform_1, window_bounds = array<i64: 32, 32>}, {transform_indices = @transform_2, window_bounds = array<i64: 1, 32>}, {transform_indices = @transform_3, window_bounds = array<i64: 8, 32>}]} {
    %c0_i32 = arith.constant 0 : i32
    %0 = arith.cmpi eq, %arg2, %c0_i32 : i32
    %1 = arith.extui %0 : i1 to i32
    %c0_i32_0 = arith.constant 0 : i32
    %2 = arith.cmpi ne, %1, %c0_i32_0 : i32
    scf.if %2 {
      %cst_10 = arith.constant 0.000000e+00 : f32
      %12 = vector.broadcast %cst_10 : f32 to vector<8x32xf32>
      %c0_11 = arith.constant 0 : index
      %c0_12 = arith.constant 0 : index
      %13 = vector.load %arg7[%c0_11, %c0_12] : memref<8x32xf32, #tpu.memory_space<vmem>>, vector<8x32xf32>
      tpu.vector_store %arg7[%c0_11, %c0_12], %12 {strides = array<i32>} : memref<8x32xf32, #tpu.memory_space<vmem>>, vector<8x32xf32>,
    } else {
    }
    %c0 = arith.constant 0 : index
    %c0_1 = arith.constant 0 : index
    %3 = vector.load %arg7[%c0, %c0_1] : memref<8x32xf32, #tpu.memory_space<vmem>>, vector<8x32xf32>
    %c0_2 = arith.constant 0 : index
    %c0_3 = arith.constant 0 : index
    %4 = vector.load %arg3[%c0_2, %c0_3] : memref<8x32xf32, #tpu.memory_space<vmem>>, vector<8x32xf32>
    %c0_4 = arith.constant 0 : index
    %c0_5 = arith.constant 0 : index
    %5 = vector.load %arg4[%c0_4, %c0_5] : memref<32x32xf32, #tpu.memory_space<vmem>>, vector<32x32xf32>
    %cst = arith.constant dense<0.000000e+00> : vector<8x32xf32>
    %6 = tpu.matmul %4, %5, %cst {dimension_numbers = #tpu.dot_dimension_numbers<[1], [1], [0], [0], [0, 0, 1, 0], [], []>} : vector<8x32xf32>, vector<32x32xf32>, vector<8x32xf32> -> vector<8x32xf32>
    %7 = arith.addf %3, %6 : vector<8x32xf32>
    %c0_6 = arith.constant 0 : index
    %c0_7 = arith.constant 0 : index
    %8 = vector.load %arg7[%c0_6, %c0_7] : memref<8x32xf32, #tpu.memory_space<vmem>>, vector<8x32xf32>
    tpu.vector_store %arg7[%c0_6, %c0_7], %7 {strides = array<i32>} : memref<8x32xf32, #tpu.memory_space<vmem>>, vector<8x32xf32>,
    %c0_i32_8 = arith.constant 0 : i32
    %9 = arith.cmpi eq, %arg2, %c0_i32_8 : i32
    %10 = arith.extui %9 : i1 to i32
    %c0_i32_9 = arith.constant 0 : i32
    %11 = arith.cmpi ne, %10, %c0_i32_9 : i32
    scf.if %11 {
      %c0_10 = arith.constant 0 : index
      %c0_11 = arith.constant 0 : index
      %12 = vector.load %arg7[%c0_10, %c0_11] : memref<8x32xf32, #tpu.memory_space<vmem>>, vector<8x32xf32>
      %c0_12 = arith.constant 0 : index
      %c0_13 = arith.constant 0 : index
      %13 = vector.load %arg5[%c0_12, %c0_13] : memref<1x32xf32, #tpu.memory_space<vmem>>, vector<1x32xf32>
      %14 = vector.broadcast %13 : vector<1x32xf32> to vector<8x32xf32>
      %15 = arith.addf %12, %14 : vector<8x32xf32>
      %c0_14 = arith.constant 0 : index
      %c0_15 = arith.constant 0 : index
      %16 = vector.load %arg6[%c0_14, %c0_15] : memref<8x32xf32, #tpu.memory_space<vmem>>, vector<8x32xf32>
      tpu.vector_store %arg6[%c0_14, %c0_15], %15 {strides = array<i32>} : memref<8x32xf32, #tpu.memory_space<vmem>>, vector<8x32xf32>,
    } else {
    }
    return
  }
  func.func @transform_0(%arg0: i32, %arg1: i32, %arg2: i32) -> (i32, i32) {
    %c0_i32 = arith.constant 0 : i32
    return %arg0, %arg2 : i32, i32
  }
  func.func @transform_1(%arg0: i32, %arg1: i32, %arg2: i32) -> (i32, i32) {
    %c0_i32 = arith.constant 0 : i32
    return %arg1, %arg2 : i32, i32
  }
  func.func @transform_2(%arg0: i32, %arg1: i32, %arg2: i32) -> (i32, i32) {
    %c0_i32 = arith.constant 0 : i32
    %c0_i32_0 = arith.constant 0 : i32
    return %c0_i32, %arg1 : i32, i32
  }
  func.func @transform_3(%arg0: i32, %arg1: i32, %arg2: i32) -> (i32, i32) {
    %c0_i32 = arith.constant 0 : i32
    return %arg0, %arg1 : i32, i32
  }
}

</mosaic_0001>

<bundles_post_ra>
// kernel: tpu_custom_call.1
= control target key start
LH: loop header
LB: loop body
LE: loop exit
PB: predicated region body
PF: predicated region fallthrough
CT: control target
= control target key end

     0   :  { %8 = vsyncpa [#allocation4], 0  ;;  %s259_s0 = inlined_call_operand.hbm [shape: f32[8,32], index: 0, kind: input, shape index: {}]   ;;  %s260_s1 = inlined_call_operand.hbm [shape: f32[32,32], index: 1, kind: input, shape index: {}]   ;;  %s261_s2 = inlined_call_operand.vmem [shape: f32[1,32], index: 2, kind: input, shape index: {}]   ;;  %s262_s3 = inlined_call_operand.hbm [shape: f32[8,32], index: 3, kind: output, shape index: {}]  }
   0x1   :  { %9 = vsyncpa [#allocation7], 0 }
   0x2   :  { %10 = vsyncpa [#allocation5], 0  ;;  %s16_s14 = sshll.u32 %s259_s0, 4  ;;  %s213_s15 = smov [#allocation3]   ;;  %s17_s14 = int_to_ptr.hbm [resolvable:$true] %s16_s14 }
   0x3   :  { %s18_s16 = sshll.u32 %s213_s15, 4  ;;  %s26_s19 = sshll.u32 %s260_s1, 4  ;;  %s19_s16 = int_to_ptr.vmem [resolvable:$true] %s18_s16  ;;  %s27_s19 = int_to_ptr.hbm [resolvable:$true] %s26_s19 }
   0x4   :  { %21 = dma.hbm_to_vmem [thread:$0]  %s17_s14, 128, %s19_s16, [#allocation4]  }
   0x5   :  { %s214_s20 = smov [#allocation6]   ;;  %s215_s22 = smov 128  }
   0x6   :  { %s28_s21 = sshll.u32 %s214_s20, 4  ;;  %s216_s23 = smov 8   ;;  %s29_s21 = int_to_ptr.vmem [resolvable:$true] %s28_s21 }
   0x7   :  { %34 = dma.hbm_to_vmem [thread:$0]  %s27_s19, 512, %s29_s21, [#allocation7], %s215_s22, %s215_s22, %s216_s23  }
   0x8   :  { %207 = dma.done.wait [#allocation4], 128  }
   0x9   :  { %208 = vsyncadd [#allocation4], 4294967168 }
   0xa   :  { %209 = dma.done.wait [#allocation7], 512  }
   0xb   :  { %210 = vsyncadd [#allocation7], 4294966784  ;;  %vm49_vm0 = vcmask 261120   ;;  %v217_v0 = vmov 0.0   ;;  %v56_v1 = vld [vmem:[#allocation6 + $0x18] sm:$0xff]  ;;  %v55_v2 = vld [vmem:[#allocation6 + $0x10] sm:$0xff] }
   0xc   :  { %50 = vst.msk [vmem:[#allocation2] sm:$0xff] %vm49_vm0, %v217_v0  ;;  %123 = vmatpush.xpose.msk.msra.mxu0 %vm49_vm0, %v56_v1  ;;  %v54_v3 = vld [vmem:[#allocation6 + $0x8] sm:$0xff]  ;;  %v53_v4 = vld [vmem:[#allocation6] sm:$0xff]  ;;  %v52_v5 = vld [vmem:[#allocation3] sm:$0xff]  ;;  %s218_s24 = smov [#allocation8]   ;;  %s112_s28 = sshll.u32 %s262_s3, 4  ;;  %s113_s28 = int_to_ptr.hbm [resolvable:$true] %s112_s28 }
   0xd   :  { %v134_v9 = vld [vmem:[%s261_s2] ss:$0 sm:$0xff]  ;;  %s110_s25 = sshll.u32 %s218_s24, 4  ;;  %s111_s25 = int_to_ptr.vmem [resolvable:$true] %s110_s25 }
  0x10   :  { %124 = vmatpush.xpose.msk.msra.mxu0 %vm49_vm0, %v55_v2 }
  0x13   :  { %v51_v6 = vld [vmem:[#allocation2] sm:$0xff] }
  0x14   :  { %125 = vmatpush.xpose.msk.msra.mxu0 %vm49_vm0, %v54_v3 }
  0x18   :  { %126 = vmatpush.xpose.msk.msra.mxu0 %vm49_vm0, %v53_v4 }
  0x1b   :  { %127 = vmatmul.msk.f32.vlgmr.msra.gmra.mxu0 %vm49_vm0, %v52_v5 }
  0x98   :  { %v90_v7 = vpop.f32.mrf.mxu0 }
  0x99   :  { %v93_v8 = vadd.f32 %v90_v7, %v51_v6 }
  0x9b   :  { %94 = vst.msk [vmem:[#allocation2] sm:$0xff] %vm49_vm0, %v93_v8 }
  0xa2   :  { %v98_v10 = vld [vmem:[#allocation2] sm:$0xff] }
  0xa3   :  { %v103_v11 = vadd.f32 %v134_v9, %v98_v10 }
  0xa5   :  { %104 = vst.msk [vmem:[#allocation8] sm:$0xff] %vm49_vm0, %v103_v11 }
  0xa6   :  { %115 = dma.vmem_to_hbm [thread:$0]  %s111_s25, 128, %s113_s28, [#allocation5]  }
  0xa7   :  { %211 = dma.done.wait [#allocation5], 128  }
  0xa8   :  { %212 = vsyncadd [#allocation5], 4294967168 }
  0xa9   :  { %120 = vsyncpa [#allocation4], 1 }
  0xaa   :  { %121 = vsyncpa [#allocation7], 1 }
  0xab   :  { %122 = vsyncpa [#allocation5], 1 }

</bundles_post_ra>
